<compile_context>
chip_gen: v7x
topology: tpu7x:2x2x1
jax: 0.10.0
libtpu: 0.0.40
codegen_flags: <defaults>
</compile_context>

<pallas_src>
import functools

import jax
import jax.numpy as jnp
from jax.experimental import pallas as pl
from jax.experimental.pallas import tpu as pltpu

LANE = 128
IN_FEATURES = 512
HIDDEN = 128


def _round_up(x, m):
    return (x + m - 1) // m * m


def fc1_lstm_kernel(x_ref, w1_ref, b1_ref, w2_ref, b2_ref, o_ref):
    # Linear(512 -> 128): x (TB, 512) @ w1t (512, 128) on the MXU, f32 accumulate.
    h = jnp.dot(x_ref[...], w1_ref[...], preferred_element_type=jnp.float32)
    # Bias + ReLU on the VPU.
    h = jnp.maximum(h + b1_ref[...], 0.0)
    # Linear(128 -> C_padded): lane-dense (128-wide) output slab.
    y = jnp.dot(h, w2_ref[...], preferred_element_type=jnp.float32)
    o_ref[...] = (y + b2_ref[...]).astype(o_ref.dtype)


def prepare_params(w1, b1, w2, b2):
    """One-time parameter prep (hoisted out of the per-call hot path).

    w1: (128, 512), b1: (128,), w2: (C, 128), b2: (C,)  [PyTorch Linear layout]
    Returns (w1t, b1r, w2t_pad, b2r_pad, num_classes) with:
      w1t     (512, 128)       -- pre-transposed so kernel does x @ W
      b1r     (1, 128)
      w2t_pad (128, C_padded)  -- transposed + zero-padded to 128 lanes
      b2r_pad (1, C_padded)
    """
    num_classes = w2.shape[0]
    c_pad = max(LANE, _round_up(num_classes, LANE))
    w1t = jnp.asarray(w1, jnp.float32).T                       # (512, 128)
    b1r = jnp.asarray(b1, jnp.float32).reshape(1, HIDDEN)      # (1, 128)
    w2t = jnp.asarray(w2, jnp.float32).T                       # (128, C)
    w2t_pad = jnp.zeros((HIDDEN, c_pad), jnp.float32).at[:, :num_classes].set(w2t)
    b2r_pad = jnp.zeros((1, c_pad), jnp.float32).at[0, :num_classes].set(
        jnp.asarray(b2, jnp.float32))
    return w1t, b1r, w2t_pad, b2r_pad, num_classes


@functools.partial(jax.jit, static_argnames=("num_classes", "block_b"))
def fc1_lstm_forward(x, w1t, b1r, w2t_pad, b2r_pad, *, num_classes, block_b=1024):
    """x: (B, 512) f32. Params as produced by prepare_params()."""
    B = x.shape[0]
    c_pad = w2t_pad.shape[1]

    # Batch tile: multiple of 8 sublanes, capped at block_b.
    tb = min(block_b, _round_up(B, 8))
    b_pad = _round_up(B, tb)
    if b_pad != B:
        x = jnp.pad(x, ((0, b_pad - B), (0, 0)))
    grid = (b_pad // tb,)

    cost = pl.CostEstimate(
        flops=2 * b_pad * IN_FEATURES * HIDDEN + 2 * b_pad * HIDDEN * c_pad,
        transcendentals=0,
        bytes_accessed=(b_pad * IN_FEATURES * 4
                        + IN_FEATURES * HIDDEN * 4 + HIDDEN * 4
                        + HIDDEN * c_pad * 4 + c_pad * 4
                        + b_pad * c_pad * 4),
    )

    out = pl.pallas_call(
        fc1_lstm_kernel,
        out_shape=jax.ShapeDtypeStruct((b_pad, c_pad), jnp.float32),
        grid=grid,
        in_specs=[
            pl.BlockSpec((tb, IN_FEATURES), lambda i: (i, 0)),   # x: tiled on batch
            pl.BlockSpec((IN_FEATURES, HIDDEN), lambda i: (0, 0)),  # w1t: resident
            pl.BlockSpec((1, HIDDEN), lambda i: (0, 0)),            # b1
            pl.BlockSpec((HIDDEN, c_pad), lambda i: (0, 0)),        # w2t (padded)
            pl.BlockSpec((1, c_pad), lambda i: (0, 0)),             # b2 (padded)
        ],
        out_specs=pl.BlockSpec((tb, c_pad), lambda i: (i, 0)),
        compiler_params=pltpu.CompilerParams(
            dimension_semantics=("parallel",),
            vmem_limit_bytes=32 * 1024 * 1024,
        ),
        cost_estimate=cost,
    )(x, w1t, b1r, w2t_pad, b2r_pad)

    # Drop batch padding and the zero-padded output lanes.
    return out[:B, :num_classes]


def make_params(key, num_classes=3):
    """Deterministic PyTorch-Linear-style init (uniform(-1/sqrt(fan_in), ...))."""
    k1, k2, k3, k4 = jax.random.split(key, 4)
    bound1 = 1.0 / jnp.sqrt(512.0)
    bound2 = 1.0 / jnp.sqrt(128.0)
    w1 = jax.random.uniform(k1, (HIDDEN, IN_FEATURES), jnp.float32, -bound1, bound1)
    b1 = jax.random.uniform(k2, (HIDDEN,), jnp.float32, -bound1, bound1)
    w2 = jax.random.uniform(k3, (num_classes, HIDDEN), jnp.float32, -bound2, bound2)
    b2 = jax.random.uniform(k4, (num_classes,), jnp.float32, -bound2, bound2)
    return w1, b1, w2, b2


if __name__ == "__main__":
    key = jax.random.PRNGKey(0)
    kx, kp = jax.random.split(key)

    B, num_classes = 8, 3
    x = jax.random.normal(kx, (B, IN_FEATURES), jnp.float32)
    w1, b1, w2, b2 = make_params(kp, num_classes)

    # One-time parameter prep (transpose / reshape / lane-pad hoisted here).
    w1t, b1r, w2t_pad, b2r_pad, nc = prepare_params(w1, b1, w2, b2)

    out = fc1_lstm_forward(x, w1t, b1r, w2t_pad, b2r_pad, num_classes=nc)
    out = jax.block_until_ready(out)

    # Pure-JAX reference of the same forward pass (PyTorch Linear semantics).
    ref = jnp.maximum(x @ w1.T + b1, 0.0) @ w2.T + b2
    assert out.shape == (B, num_classes)
    assert jnp.allclose(out, ref, atol=1e-5, rtol=1e-5)

    print("KERNEL_OK")
</pallas_src>

<mosaic_0001>
module attributes {stable_mosaic.version = 11 : i64} {
  func.func @fc1_lstm_kernel(%arg0: i32, %arg1: memref<8x512xf32, #tpu.memory_space<vmem>>, %arg2: memref<512x128xf32, #tpu.memory_space<vmem>>, %arg3: memref<1x128xf32, #tpu.memory_space<vmem>>, %arg4: memref<128x128xf32, #tpu.memory_space<vmem>>, %arg5: memref<1x128xf32, #tpu.memory_space<vmem>>, %arg6: memref<8x128xf32, #tpu.memory_space<vmem>>) attributes {dimension_semantics = [#tpu.dimension_semantics<parallel>], iteration_bounds = array<i64: 1>, scalar_prefetch = 0 : i64, scratch_operands = 0 : i64, tpu.core_type = #tpu.core_type<tc>, window_params = [{transform_indices = @transform_0, window_bounds = array<i64: 8, 512>}, {pipeline_mode = #tpu.pipeline_mode<synchronous>, transform_indices = @transform_1, window_bounds = array<i64: 512, 128>}, {pipeline_mode = #tpu.pipeline_mode<synchronous>, transform_indices = @transform_2, window_bounds = array<i64: 1, 128>}, {pipeline_mode = #tpu.pipeline_mode<synchronous>, transform_indices = @transform_3, window_bounds = array<i64: 128, 128>}, {pipeline_mode = #tpu.pipeline_mode<synchronous>, transform_indices = @transform_4, window_bounds = array<i64: 1, 128>}, {transform_indices = @transform_5, window_bounds = array<i64: 8, 128>}]} {
    %c0 = arith.constant 0 : index
    %c0_0 = arith.constant 0 : index
    %0 = vector.load %arg1[%c0, %c0_0] : memref<8x512xf32, #tpu.memory_space<vmem>>, vector<8x512xf32>
    %c0_1 = arith.constant 0 : index
    %c0_2 = arith.constant 0 : index
    %1 = vector.load %arg2[%c0_1, %c0_2] : memref<512x128xf32, #tpu.memory_space<vmem>>, vector<512x128xf32>
    %cst = arith.constant dense<0.000000e+00> : vector<8x128xf32>
    %2 = tpu.matmul %0, %1, %cst {dimension_numbers = #tpu.dot_dimension_numbers<[1], [0], [0], [1], [0, 0, 1, 1], [], []>} : vector<8x512xf32>, vector<512x128xf32>, vector<8x128xf32> -> vector<8x128xf32>
    %c0_3 = arith.constant 0 : index
    %c0_4 = arith.constant 0 : index
    %3 = vector.load %arg3[%c0_3, %c0_4] : memref<1x128xf32, #tpu.memory_space<vmem>>, vector<1x128xf32>
    %4 = vector.broadcast %3 : vector<1x128xf32> to vector<8x128xf32>
    %5 = arith.addf %2, %4 : vector<8x128xf32>
    %cst_5 = arith.constant 0.000000e+00 : f32
    %6 = vector.broadcast %cst_5 : f32 to vector<8x128xf32>
    %7 = arith.maximumf %5, %6 : vector<8x128xf32>
    %c0_6 = arith.constant 0 : index
    %c0_7 = arith.constant 0 : index
    %8 = vector.load %arg4[%c0_6, %c0_7] : memref<128x128xf32, #tpu.memory_space<vmem>>, vector<128x128xf32>
    %cst_8 = arith.constant dense<0.000000e+00> : vector<8x128xf32>
    %9 = tpu.matmul %7, %8, %cst_8 {dimension_numbers = #tpu.dot_dimension_numbers<[1], [0], [0], [1], [0, 0, 1, 1], [], []>} : vector<8x128xf32>, vector<128x128xf32>, vector<8x128xf32> -> vector<8x128xf32>
    %c0_9 = arith.constant 0 : index
    %c0_10 = arith.constant 0 : index
    %10 = vector.load %arg5[%c0_9, %c0_10] : memref<1x128xf32, #tpu.memory_space<vmem>>, vector<1x128xf32>
    %11 = vector.broadcast %10 : vector<1x128xf32> to vector<8x128xf32>
    %12 = arith.addf %9, %11 : vector<8x128xf32>
    %c0_11 = arith.constant 0 : index
    %c0_12 = arith.constant 0 : index
    %13 = vector.load %arg6[%c0_11, %c0_12] : memref<8x128xf32, #tpu.memory_space<vmem>>, vector<8x128xf32>
    tpu.vector_store %arg6[%c0_11, %c0_12], %12 {strides = array<i32>} : memref<8x128xf32, #tpu.memory_space<vmem>>, vector<8x128xf32>,
    return
  }
  func.func @transform_0(%arg0: i32) -> (i32, i32) {
    %c0_i32 = arith.constant 0 : i32
    %c0_i32_0 = arith.constant 0 : i32
    return %arg0, %c0_i32 : i32, i32
  }
  func.func @transform_1(%arg0: i32) -> (i32, i32) {
    %c0_i32 = arith.constant 0 : i32
    %c0_i32_0 = arith.constant 0 : i32
    %c0_i32_1 = arith.constant 0 : i32
    return %c0_i32, %c0_i32_0 : i32, i32
  }
  func.func @transform_2(%arg0: i32) -> (i32, i32) {
    %c0_i32 = arith.constant 0 : i32
    %c0_i32_0 = arith.constant 0 : i32
    %c0_i32_1 = arith.constant 0 : i32
    return %c0_i32, %c0_i32_0 : i32, i32
  }
  func.func @transform_3(%arg0: i32) -> (i32, i32) {
    %c0_i32 = arith.constant 0 : i32
    %c0_i32_0 = arith.constant 0 : i32
    %c0_i32_1 = arith.constant 0 : i32
    return %c0_i32, %c0_i32_0 : i32, i32
  }
  func.func @transform_4(%arg0: i32) -> (i32, i32) {
    %c0_i32 = arith.constant 0 : i32
    %c0_i32_0 = arith.constant 0 : i32
    %c0_i32_1 = arith.constant 0 : i32
    return %c0_i32, %c0_i32_0 : i32, i32
  }
  func.func @transform_5(%arg0: i32) -> (i32, i32) {
    %c0_i32 = arith.constant 0 : i32
    %c0_i32_0 = arith.constant 0 : i32
    return %arg0, %c0_i32 : i32, i32
  }
}

</mosaic_0001>

<bundles_post_ra>
// kernel: fc1_lstm_forward.1
= control target key start
LH: loop header
LB: loop body
LE: loop exit
PB: predicated region body
PF: predicated region fallthrough
CT: control target
= control target key end

     0   :  { %10 = vsyncpa [#allocation3], 0  ;;  %s754_s0 = inlined_call_operand.hbm [shape: f32[8,512], index: 0, kind: input, shape index: {}]   ;;  %s755_s1 = inlined_call_operand.hbm [shape: f32[512,128], index: 1, kind: input, shape index: {}]   ;;  %s756_s2 = inlined_call_operand.vmem [shape: f32[1,128], index: 2, kind: input, shape index: {}]   ;;  %s757_s3 = inlined_call_operand.hbm [shape: f32[128,128], index: 3, kind: input, shape index: {}]   ;;  %s758_s4 = inlined_call_operand.vmem [shape: f32[1,128], index: 4, kind: input, shape index: {}]   ;;  %s759_s5 = inlined_call_operand.vmem [shape: f32[8,128], index: 5, kind: output, shape index: {}]  }
   0x1   :  { %11 = vsyncpa [#allocation5], 0  ;;  %s665_s18 = smov [#allocation4]   ;;  %s595_s22 = scalar_lea.hbm %s755_s1, 8192 }
   0x2   :  { %s27_s19 = sshll.u32 %s665_s18, 4  ;;  %p596_p0 = scmp.ne.s32.totalorder %s755_s1, %s595_s22  ;;  %s28_s19 = int_to_ptr.vmem [resolvable:$true] %s27_s19 }
   0x3   :  { %p599_p1 = scmp.lt.u32.totalorder %s595_s22, %s755_s1 }
   0x5   :  { %p601_p2 = pnand %p599_p1, %p596_p0 }
   0x7   :  { %604 = shalt.err (!%p601_p2)
}
   0x8   :  { %s605_s27 = scalar_lea.vmem %s28_s19, 8192  ;;  %p610_p4 = scmp.lt.s32.totalorder %s28_s19, %s28_s19 }
   0x9   :  { %p606_p3 = scmp.ne.s32.totalorder %s28_s19, %s605_s27  ;;  %p611_p5 = scmp.lt.s32.totalorder %s605_s27, %s605_s27 }
   0xb   :  { %p612_p6 = por %p611_p5, %p610_p4 }
   0xd   :  { %p613_p7 = pnand %p612_p6, %p606_p3 }
   0xf   :  { %616 = shalt.err (!%p613_p7)
}
  0x10   :  { %s666_s28 = smov 128   ;;  %s667_s29 = smov 8  }
  0x11   :  { %33 = dma.hbm_to_vmem [thread:$0]  %s755_s1, 8192, %s28_s19, [#allocation5], %s666_s28, %s666_s28, %s667_s29  }
  0x12   :  { %s668_s7 = smov [#allocation2]   ;;  %s669_s9 = smov [#allocation6]  }
  0x13   :  { %s18_s8 = sshll.u32 %s668_s7, 4  ;;  %s41_s10 = sshll.u32 %s669_s9, 4  ;;  %s19_s8 = int_to_ptr.vmem [resolvable:$true] %s18_s8  ;;  %s42_s10 = int_to_ptr.vmem [resolvable:$true] %s41_s10 }
  0x14   :  { %s617_s13 = scalar_lea.hbm %s754_s0, 512 }
  0x15   :  { %p618_p8 = scmp.ne.s32.totalorder %s754_s0, %s617_s13  ;;  %p621_p9 = scmp.lt.u32.totalorder %s617_s13, %s754_s0 }
  0x17   :  { %p623_p10 = pnand %p621_p9, %p618_p8 }
  0x19   :  { %626 = shalt.err (!%p623_p10)
}
  0x1a   :  { %s627_s1 = scalar_lea.vmem %s19_s8, 512  ;;  %p632_p12 = scmp.lt.s32.totalorder %s19_s8, %s19_s8 }
  0x1b   :  { %p628_p11 = scmp.ne.s32.totalorder %s19_s8, %s627_s1  ;;  %p633_p13 = scmp.lt.s32.totalorder %s627_s1, %s627_s1 }
  0x1d   :  { %p634_p0 = por %p633_p13, %p632_p12 }
  0x1f   :  { %p635_p1 = pnand %p634_p0, %p628_p11 }
  0x21   :  { %638 = shalt.err (!%p635_p1)
}
  0x22   :  { %21 = dma.hbm_to_vmem [thread:$0]  %s754_s0, 512, %s19_s8, [#allocation3]  }
  0x23   :  { %s639_s22 = scalar_lea.hbm %s757_s3, 2048 }
  0x24   :  { %p640_p2 = scmp.ne.s32.totalorder %s757_s3, %s639_s22  ;;  %p643_p3 = scmp.lt.u32.totalorder %s639_s22, %s757_s3 }
  0x26   :  { %p645_p4 = pnand %p643_p3, %p640_p2 }
  0x28   :  { %648 = shalt.err (!%p645_p4)
}
  0x29   :  { %s649_s27 = scalar_lea.vmem %s42_s10, 2048  ;;  %p654_p6 = scmp.lt.s32.totalorder %s42_s10, %s42_s10 }
  0x2a   :  { %p650_p5 = scmp.ne.s32.totalorder %s42_s10, %s649_s27  ;;  %p655_p7 = scmp.lt.s32.totalorder %s649_s27, %s649_s27 }
  0x2c   :  { %p656_p8 = por %p655_p7, %p654_p6 }
  0x2e   :  { %p657_p9 = pnand %p656_p8, %p650_p5 }
  0x30   :  { %660 = shalt.err (!%p657_p9)
}
  0x31   :  { %47 = dma.hbm_to_vmem [thread:$0]  %s757_s3, 2048, %s42_s10, [#allocation5], %s666_s28, %s666_s28, %s667_s29  }
  0x32   :  { %661 = dma.done.wait [#allocation3], 512  }
  0x33   :  { %662 = vsyncadd [#allocation3], 4294966784 }
  0x34   :  { %663 = dma.done.wait [#allocation5], 10240  }
  0x35   :  { %664 = vsyncadd [#allocation5], 4294957056  ;;  %v79_v0 = vld [vmem:[#allocation4 + $0x80] sm:$0xff]  ;;  %v80_v1 = vld [vmem:[#allocation4 + $0x88] sm:$0xff]  ;;  %vm671_vm0 = vmmov 0  }
  0x36   :  { %v63_v2 = vld [vmem:[#allocation4] sm:$0xff]  ;;  %v499_v3 = vpack.c.bf16 %v80_v1, %v79_v0  ;;  %v64_v4 = vld [vmem:[#allocation4 + $0x8] sm:$0xff]  ;;  %v81_v11 = vld [vmem:[#allocation4 + $0x90] sm:$0xff] }
  0x37   :  { %v111_v5 = vld [vmem:[#allocation4 + $0x180] sm:$0xff]  ;;  %v112_v6 = vld [vmem:[#allocation4 + $0x188] sm:$0xff]  ;;  %v501_v7 = vpack.c.bf16 %v64_v4, %v63_v2  ;;  %v82_v13 = vld [vmem:[#allocation4 + $0x98] sm:$0xff] }
  0x38   :  { %v531_v8 = vpack.c.bf16 %v112_v6, %v111_v5  ;;  %v95_v9 = vld [vmem:[#allocation4 + $0x100] sm:$0xff]  ;;  %v96_v10 = vld [vmem:[#allocation4 + $0x108] sm:$0xff]  ;;  %500 = vmatprep.subr.bf16.mxu0 %v499_v3  ;;  %v65_v14 = vld [vmem:[#allocation4 + $0x10] sm:$0xff]  ;;  %v503_v16 = vpack.c.bf16 %v82_v13, %v81_v11 }
  0x39   :  { %v533_v12 = vpack.c.bf16 %v96_v10, %v95_v9  ;;  %v66_v15 = vld [vmem:[#allocation4 + $0x18] sm:$0xff]  ;;  %502 = vmatpush3.bf16.msra.mxu0 %v501_v7  ;;  %v113_v18 = vld [vmem:[#allocation4 + $0x190] sm:$0xff]  ;;  %v83_v23 = vld [vmem:[#allocation4 + $0xa0] sm:$0xff] }
  0x3a   :  { %532 = vmatprep.subr.bf16.mxu1 %v531_v8  ;;  %v505_v17 = vpack.c.bf16 %v66_v15, %v65_v14  ;;  %v114_v19 = vld [vmem:[#allocation4 + $0x198] sm:$0xff]  ;;  %v97_v20 = vld [vmem:[#allocation4 + $0x110] sm:$0xff]  ;;  %v84_v24 = vld [vmem:[#allocation4 + $0xa8] sm:$0xff]  ;;  %504 = vmatprep.subr.bf16.mxu0 %v503_v16 }
  0x3b   :  { %534 = vmatpush3.bf16.msra.mxu1 %v533_v12  ;;  %v535_v21 = vpack.c.bf16 %v114_v19, %v113_v18  ;;  %v98_v22 = vld [vmem:[#allocation4 + $0x118] sm:$0xff]  ;;  %v507_v26 = vpack.c.bf16 %v84_v24, %v83_v23  ;;  %v67_v27 = vld [vmem:[#allocation4 + $0x20] sm:$0xff]  ;;  %v68_v28 = vld [vmem:[#allocation4 + $0x28] sm:$0xff] }
  0x3c   :  { %v537_v25 = vpack.c.bf16 %v98_v22, %v97_v20  ;;  %v115_v29 = vld [vmem:[#allocation4 + $0x1a0] sm:$0xff]  ;;  %v116_v30 = vld [vmem:[#allocation4 + $0x1a8] sm:$0xff]  ;;  %v509_v33 = vpack.c.bf16 %v68_v28, %v67_v27  ;;  %v85_v35 = vld [vmem:[#allocation4 + $0xb0] sm:$0xff] }
  0x3d   :  { %536 = vmatprep.subr.bf16.mxu1 %v535_v21  ;;  %v99_v31 = vld [vmem:[#allocation4 + $0x120] sm:$0xff]  ;;  %v100_v32 = vld [vmem:[#allocation4 + $0x128] sm:$0xff]  ;;  %506 = vmatpush3.bf16.msra.mxu0 %v505_v17  ;;  %v539_v34 = vpack.c.bf16 %v116_v30, %v115_v29  ;;  %v86_v36 = vld [vmem:[#allocation4 + $0xb8] sm:$0xff] }
  0x3e   :  { %v69_v37 = vld [vmem:[#allocation4 + $0x30] sm:$0xff]  ;;  %508 = vmatprep.subr.bf16.mxu0 %v507_v26  ;;  %v541_v38 = vpack.c.bf16 %v100_v32, %v99_v31  ;;  %v511_v39 = vpack.c.bf16 %v86_v36, %v85_v35  ;;  %v70_v40 = vld [vmem:[#allocation4 + $0x38] sm:$0xff]  ;;  %v87_v46 = vld [vmem:[#allocation4 + $0xc0] sm:$0xff] }
  0x3f   :  { %538 = vmatpush3.bf16.msra.mxu1 %v537_v25  ;;  %v117_v41 = vld [vmem:[#allocation4 + $0x1b0] sm:$0xff]  ;;  %v118_v42 = vld [vmem:[#allocation4 + $0x1b8] sm:$0xff]  ;;  %v88_v47 = vld [vmem:[#allocation4 + $0xc8] sm:$0xff]  ;;  %v513_v48 = vpack.c.bf16 %v70_v40, %v69_v37 }
  0x40   :  { %540 = vmatprep.subr.bf16.mxu1 %v539_v34  ;;  %v543_v43 = vpack.c.bf16 %v118_v42, %v117_v41  ;;  %v101_v44 = vld [vmem:[#allocation4 + $0x130] sm:$0xff]  ;;  %v102_v45 = vld [vmem:[#allocation4 + $0x138] sm:$0xff]  ;;  %v119_v49 = vld [vmem:[#allocation4 + $0x1c0] sm:$0xff]  ;;  %v515_v52 = vpack.c.bf16 %v88_v47, %v87_v46 }
  0x41   :  { %510 = vmatpush3.bf16.msra.mxu0 %v509_v33  ;;  %v120_v50 = vld [vmem:[#allocation4 + $0x1c8] sm:$0xff]  ;;  %v545_v51 = vpack.c.bf16 %v102_v45, %v101_v44  ;;  %v71_v53 = vld [vmem:[#allocation4 + $0x40] sm:$0xff]  ;;  %v89_v58 = vld [vmem:[#allocation4 + $0xd0] sm:$0xff] }
  0x42   :  { %512 = vmatprep.subr.bf16.mxu0 %v511_v39  ;;  %v72_v54 = vld [vmem:[#allocation4 + $0x48] sm:$0xff]  ;;  %v103_v55 = vld [vmem:[#allocation4 + $0x140] sm:$0xff]  ;;  %v547_v56 = vpack.c.bf16 %v120_v50, %v119_v49  ;;  %v90_v59 = vld [vmem:[#allocation4 + $0xd8] sm:$0xff]  ;;  %v670_v39 = vmov 0.0|0.0  }
  0x43   :  { %542 = vmatpush3.bf16.msra.mxu1 %v541_v38  ;;  %v104_v57 = vld [vmem:[#allocation4 + $0x148] sm:$0xff]  ;;  %v121_v60 = vld [vmem:[#allocation4 + $0x1d0] sm:$0xff]  ;;  %v122_v61 = vld [vmem:[#allocation4 + $0x1d8] sm:$0xff]  ;;  %v517_v62 = vpack.c.bf16 %v72_v54, %v71_v53  ;;  %v519_v0 = vpack.c.bf16 %v90_v59, %v89_v58 }
  0x44   :  { %544 = vmatprep.subr.bf16.mxu1 %v543_v43  ;;  %v549_v63 = vpack.c.bf16 %v104_v57, %v103_v55  ;;  %v73_v1 = vld [vmem:[#allocation4 + $0x50] sm:$0xff]  ;;  %v74_v2 = vld [vmem:[#allocation4 + $0x58] sm:$0xff]  ;;  %v551_v4 = vpack.c.bf16 %v122_v61, %v121_v60  ;;  %v91_v6 = vld [vmem:[#allocation4 + $0xe0] sm:$0xff]  ;;  %v672_v61 = vmov 0.0  }
  0x45   :  { %514 = vmatpush3.bf16.msra.mxu0 %v513_v48  ;;  %v105_v3 = vld [vmem:[#allocation4 + $0x150] sm:$0xff]  ;;  %v106_v5 = vld [vmem:[#allocation4 + $0x158] sm:$0xff]  ;;  %v92_v7 = vld [vmem:[#allocation4 + $0xe8] sm:$0xff]  ;;  %v521_v10 = vpack.c.bf16 %v74_v2, %v73_v1 }
  0x46   :  { %516 = vmatprep.subr.bf16.mxu0 %v515_v52  ;;  %v123_v8 = vld [vmem:[#allocation4 + $0x1e0] sm:$0xff]  ;;  %v124_v9 = vld [vmem:[#allocation4 + $0x1e8] sm:$0xff]  ;;  %v553_v13 = vpack.c.bf16 %v106_v5, %v105_v3  ;;  %v523_v14 = vpack.c.bf16 %v92_v7, %v91_v6  ;;  %v93_v19 = vld [vmem:[#allocation4 + $0xf0] sm:$0xff] }
  0x47   :  { %546 = vmatpush3.bf16.msra.mxu1 %v545_v51  ;;  %v75_v11 = vld [vmem:[#allocation4 + $0x60] sm:$0xff]  ;;  %v76_v12 = vld [vmem:[#allocation4 + $0x68] sm:$0xff]  ;;  %v555_v18 = vpack.c.bf16 %v124_v9, %v123_v8  ;;  %v94_v20 = vld [vmem:[#allocation4 + $0xf8] sm:$0xff] }
  0x48   :  { %548 = vmatprep.subr.bf16.mxu1 %v547_v56  ;;  %v107_v15 = vld [vmem:[#allocation4 + $0x160] sm:$0xff]  ;;  %v108_v16 = vld [vmem:[#allocation4 + $0x168] sm:$0xff]  ;;  %v62_v21 = vld [vmem:[#allocation2 + $0x18] sm:$0xff]  ;;  %v525_v24 = vpack.c.bf16 %v76_v12, %v75_v11  ;;  %v527_v26 = vpack.c.bf16 %v94_v20, %v93_v19 }
  0x49   :  { %518 = vmatpush3.bf16.msra.mxu0 %v517_v62  ;;  %v60_v17 = vld [vmem:[#allocation2 + $0x8] sm:$0xff]  ;;  %v125_v22 = vld [vmem:[#allocation4 + $0x1f0] sm:$0xff]  ;;  %v126_v23 = vld [vmem:[#allocation4 + $0x1f8] sm:$0xff]  ;;  %268 = vmatprep.mubr.f32.mxu1 %v62_v21  ;;  %v557_v25 = vpack.c.bf16 %v108_v16, %v107_v15 }
  0x4a   :  { %520 = vmatprep.subr.bf16.mxu0 %v519_v0  ;;  %198 = vmatprep.mubr.f32.mxu0 %v60_v17  ;;  %v77_v27 = vld [vmem:[#allocation4 + $0x70] sm:$0xff]  ;;  %v78_v28 = vld [vmem:[#allocation4 + $0x78] sm:$0xff]  ;;  %v559_v29 = vpack.c.bf16 %v126_v23, %v125_v22  ;;  %v275_v34 = vld [vmem:[#allocation6] sm:$0xff] }
  0x4b   :  { %550 = vmatpush3.bf16.msra.mxu1 %v549_v63  ;;  %v109_v30 = vld [vmem:[#allocation4 + $0x170] sm:$0xff]  ;;  %v110_v31 = vld [vmem:[#allocation4 + $0x178] sm:$0xff]  ;;  %v529_v32 = vpack.c.bf16 %v78_v28, %v77_v27  ;;  %v276_v35 = vld [vmem:[#allocation6 + $0x8] sm:$0xff] }
  0x4c   :  { %552 = vmatprep.subr.bf16.mxu1 %v551_v4  ;;  %v561_v33 = vpack.c.bf16 %v110_v31, %v109_v30  ;;  %v59_v36 = vld [vmem:[#allocation2] sm:$0xff]  ;;  %v564_v37 = vpack.c.bf16 %v276_v35, %v275_v34  ;;  %v61_v38 = vld [vmem:[#allocation2 + $0x10] sm:$0xff]  ;;  %v278_v41 = vld [vmem:[#allocation6 + $0x18] sm:$0xff] }
  0x4d   :  { %522 = vmatpush3.bf16.msra.mxu0 %v521_v10  ;;  %v277_v40 = vld [vmem:[#allocation6 + $0x10] sm:$0xff]  ;;  %v279_v43 = vld [vmem:[#allocation6 + $0x20] sm:$0xff]  ;;  %v280_v44 = vld [vmem:[#allocation6 + $0x28] sm:$0xff] }
  0x4e   :  { %524 = vmatprep.subr.bf16.mxu0 %v523_v14  ;;  %v567_v42 = vpack.c.bf16 %v278_v41, %v277_v40  ;;  %v570_v45 = vpack.c.bf16 %v280_v44, %v279_v43  ;;  %v281_v46 = vld [vmem:[#allocation6 + $0x30] sm:$0xff]  ;;  %v282_v47 = vld [vmem:[#allocation6 + $0x38] sm:$0xff]  ;;  %v283_v49 = vld [vmem:[#allocation6 + $0x40] sm:$0xff] }
  0x4f   :  { %554 = vmatpush3.bf16.msra.mxu1 %v553_v13  ;;  %v573_v48 = vpack.c.bf16 %v282_v47, %v281_v46  ;;  %v284_v50 = vld [vmem:[#allocation6 + $0x48] sm:$0xff]  ;;  %v285_v52 = vld [vmem:[#allocation6 + $0x50] sm:$0xff]  ;;  %v286_v53 = vld [vmem:[#allocation6 + $0x58] sm:$0xff] }
  0x50   :  { %556 = vmatprep.subr.bf16.mxu1 %v555_v18  ;;  %v576_v51 = vpack.c.bf16 %v284_v50, %v283_v49  ;;  %v579_v54 = vpack.c.bf16 %v286_v53, %v285_v52  ;;  %v287_v55 = vld [vmem:[#allocation6 + $0x60] sm:$0xff]  ;;  %v288_v56 = vld [vmem:[#allocation6 + $0x68] sm:$0xff]  ;;  %v289_v58 = vld [vmem:[#allocation6 + $0x70] sm:$0xff] }
  0x51   :  { %526 = vmatpush3.bf16.msra.mxu0 %v525_v24  ;;  %v582_v57 = vpack.c.bf16 %v288_v56, %v287_v55  ;;  %v290_v59 = vld [vmem:[#allocation6 + $0x78] sm:$0xff]  ;;  %v375_v63 = vld [vmem:[%s756_s2] ss:$0 sm:$0xff] }
  0x52   :  { %528 = vmatprep.subr.bf16.mxu0 %v527_v26  ;;  %v585_v60 = vpack.c.bf16 %v290_v59, %v289_v58  ;;  %v376_v8 = vld [vmem:[%s758_s4] ss:$0 sm:$0xff] }
  0x53   :  { %558 = vmatpush3.bf16.msra.mxu1 %v557_v25 }
  0x54   :  { %560 = vmatprep.subr.bf16.mxu1 %v559_v29 }
  0x55   :  { %530 = vmatpush3.bf16.msra.mxu0 %v529_v32 }
  0x56   :  { %563 = vmatprep.subr.bf16.mxu0 %v670_v39 }
  0x57   :  { %562 = vmatpush3.bf16.msra.mxu1 %v561_v33 }
  0x58   :  { %199 = vmatmul.mubr.f32.vlgmr.msra.gmra.mrb[0].mxu0 %v59_v36 }
  0x59   :  { %565 = vmatpush3.bf16.msra.mxu0 %v564_v37  ;;  %496 = vmatprep.mubr.msk.f32.mxu0 %vm671_vm0, %v672_v61 }
  0x5a   :  { %269 = vmatmul.mubr.f32.vlgmr.msra.gmra.mrb[0].mxu1 %v61_v38  ;;  %566 = vmatprep.subr.bf16.mxu0 %v670_v39 }
  0x5d   :  { %568 = vmatpush3.bf16.msra.mxu0 %v567_v42 }
  0x5e   :  { %569 = vmatprep.subr.bf16.mxu0 %v670_v39 }
  0x61   :  { %571 = vmatpush3.bf16.msra.mxu0 %v570_v45 }
  0x62   :  { %572 = vmatprep.subr.bf16.mxu0 %v670_v39 }
  0x65   :  { %574 = vmatpush3.bf16.msra.mxu0 %v573_v48 }
  0x66   :  { %575 = vmatprep.subr.bf16.mxu0 %v670_v39 }
  0x69   :  { %577 = vmatpush3.bf16.msra.mxu0 %v576_v51 }
  0x6a   :  { %578 = vmatprep.subr.bf16.mxu0 %v670_v39 }
  0x6d   :  { %580 = vmatpush3.bf16.msra.mxu0 %v579_v54 }
  0x6e   :  { %581 = vmatprep.subr.bf16.mxu0 %v670_v39 }
  0x71   :  { %583 = vmatpush3.bf16.msra.mxu0 %v582_v57 }
  0x72   :  { %584 = vmatprep.subr.bf16.mxu0 %v670_v39 }
  0x75   :  { %586 = vmatpush3.bf16.msra.mxu0 %v585_v60 }
 0x12b   :  { %v409_v62 = vpop.f32.mrb[0].mxu0 }
 0x12c   :  { %v410_v0 = vpop.f32.mrb[1].mxu0 }
 0x12d   :  { %v444_v1 = vpop.f32.mrb[0].mxu1  ;;  %v411_v2 = vadd.f32 %v410_v0, %v409_v62 }
 0x12e   :  { %v445_v3 = vpop.f32.mrb[1].mxu1 }
 0x12f   :  { %v446_v4 = vadd.f32 %v445_v3, %v444_v1  ;;  %v201_v5 = vadd.f32 %v411_v2, %v375_v63 }
 0x131   :  { %v271_v6 = vadd.f32 %v446_v4, %v201_v5 }
 0x133   :  { %v274_v7 = vmax.f32 %v271_v6, 0.0 }
 0x135   :  { %497 = vmatmul.mubr.f32.vlgmr.msra.gmra.mrb[2].mxu0 %v274_v7 }
 0x208   :  { %v364_v9 = vpop.f32.mrb[2].mxu0 }
 0x209   :  { %v365_v10 = vadd.f32 %v376_v8, %v364_v9  ;;  %v498_v11 = vpop.f32.mrb[3].mxu0 }
 0x20b   :  { %368 = vst [vmem:[%s759_s5] sm:$0xff] %v365_v10 }
 0x20c   :  { %373 = vsyncpa [#allocation3], 1 }
 0x20d   :  { %374 = vsyncpa [#allocation5], 1 }

</bundles_post_ra>
